<compile_context>
chip_gen: v7x
topology: tpu7x:2x2x1
jax: 0.10.0
libtpu: 0.0.40
codegen_flags: <defaults>
</compile_context>

<pallas_src>
import functools

import jax
import jax.numpy as jnp
from jax.experimental import pallas as pl
from jax.experimental.pallas import tpu as pltpu

LN_EPS = 1e-5  # PyTorch nn.LayerNorm default


def _round_up(n, m):
    return ((n + m - 1) // m) * m


def _pwfc_kernel(x_ref, att_ref,
                 w1_ref, b1_ref, w2_ref, b2_ref,
                 g1_ref, be1_ref, g2_ref, be2_ref,
                 o_ref,
                 hn_f32_ref, hn_bf16_ref, acc_ref):
    """Grid = (token_tiles, hidden_tiles).

    The hidden axis is the reduction axis and MUST stay last/innermost
    ("arbitrary"): hn_*/acc scratch carry state across its iterations.
    """
    h_idx = pl.program_id(1)
    n_h = pl.num_programs(1)

    # ---- first hidden step: residual add + LayerNorm1, init accumulator ----
    @pl.when(h_idx == 0)
    def _():
        h = x_ref[...].astype(jnp.float32) + att_ref[...].astype(jnp.float32)
        mu = jnp.mean(h, axis=-1, keepdims=True)
        m2 = jnp.mean(h * h, axis=-1, keepdims=True)
        var = jnp.maximum(m2 - mu * mu, 0.0)          # one-pass moments (f32)
        hn = (h - mu) * jax.lax.rsqrt(var + LN_EPS)
        hn = hn * g1_ref[...] + be1_ref[...]
        hn_f32_ref[...] = hn                          # kept for LN2 residual
        hn_bf16_ref[...] = hn.astype(jnp.bfloat16)    # MXU operand, cast once
        acc_ref[...] = jnp.zeros_like(acc_ref)

    # ---- FFN chunk over this hidden-dim tile (bf16 MXU, f32 accumulate) ----
    z = jnp.dot(hn_bf16_ref[...], w1_ref[...], preferred_element_type=jnp.float32)
    z = jnp.maximum(z + b1_ref[...], 0.0)
    acc_ref[...] += jnp.dot(z.astype(jnp.bfloat16), w2_ref[...],
                            preferred_element_type=jnp.float32)

    # ---- last hidden step: residual add + LayerNorm2, write output ---------
    @pl.when(h_idx == n_h - 1)
    def _():
        y = hn_f32_ref[...] + acc_ref[...] + b2_ref[...]
        mu = jnp.mean(y, axis=-1, keepdims=True)
        m2 = jnp.mean(y * y, axis=-1, keepdims=True)
        var = jnp.maximum(m2 - mu * mu, 0.0)
        yn = (y - mu) * jax.lax.rsqrt(var + LN_EPS)
        o_ref[...] = (yn * g2_ref[...] + be2_ref[...]).astype(o_ref.dtype)


@functools.partial(jax.jit, static_argnames=("block_rows", "hidden_block"))
def position_wise_fc(x, output, params, *, block_rows=256, hidden_block=512):
    """x, output: [batch, seq, emb].  params: from prepare_params().

    Returns [batch, seq, emb].
    """
    B, S, E = x.shape
    H = params["w1"].shape[1]
    rows = B * S
    io_bytes = jnp.dtype(x.dtype).itemsize

    # ---------- per-generation VMEM budget -----------------------------------
    try:
        vmem_cap = int(pltpu.get_tpu_info().vmem_capacity_bytes)
    except Exception:
        vmem_cap = 64 << 20  # conservative: v7x per-TensorCore VMEM
    budget = max(vmem_cap - (8 << 20), 24 << 20)     # headroom for internals

    def footprint(br, tkh, w_buffers):
        tok = 3 * 2 * br * E * io_bytes               # x, att, out (double-buf)
        wts = w_buffers * 2 * E * tkh * 2             # w1 + w2 tiles, bf16
        vecs = 2 * (4 * E + tkh) * 4                  # biases / LN params
        scratch = br * E * (4 + 4 + 2) + br * tkh * 4  # hn f32/bf16, acc, z
        return tok + wts + vecs + scratch

    # ---------- tiling decision ----------------------------------------------
    rows8 = _round_up(rows, 8)
    br = max(8, min(block_rows, rows8))

    if footprint(br, H, w_buffers=1) <= budget:
        # Weights fully resident (single-buffered): DMA'd from HBM exactly once.
        tk_h = H
    else:
        # Tile H: largest 128-multiple divisor of H <= hidden_block (MXU/lane
        # aligned), never the silent full-H fallback of the previous version.
        tk_h = None
        t = (min(hidden_block, H) // 128) * 128
        while t >= 128:
            if H % t == 0:
                tk_h = t
                break
            t -= 128
        if tk_h is None:
            # TODO(synk): ragged H (no 128-multiple divisor) falls back to
            # full-H weight tiles; may pressure VMEM for very large E*H.
            tk_h = H
        if H // tk_h > 1:
            # Bigger token tiles amortize the per-token-tile weight re-stream.
            for cand_br in (1024, 512):
                cbr = min(cand_br, rows8)
                if cbr > br and footprint(cbr, tk_h, w_buffers=2) <= budget:
                    br = cbr
                    break

    block_rows = br
    grid_h = H // tk_h
    grid_rows = pl.cdiv(rows, block_rows)             # no host-side padding
    w_single = (grid_h == 1)                          # constant-index weights

    # ---------- VMEM limit capped at real capacity ---------------------------
    need = footprint(block_rows, tk_h, 1 if w_single else 2)
    vmem_limit = int(min(max(int(need * 1.4) + (4 << 20), 32 << 20),
                         vmem_cap - (2 << 20)))

    # ---------- cost estimate (counts weight re-streaming when H is tiled) ---
    w_stream = grid_rows if grid_h > 1 else 1
    cost = pl.CostEstimate(
        flops=4 * rows * E * H,
        transcendentals=2 * rows,
        bytes_accessed=(3 * rows * E * io_bytes
                        + w_stream * 2 * E * H * 2
                        + (4 * E + H) * 2 * 4),
    )

    # ---------- specs ---------------------------------------------------------
    def spec(shape, index_map, single):
        if single:
            try:
                # Constant-index block: one resident buffer, fetched once.
                return pl.BlockSpec(shape, index_map,
                                    pipeline_mode=pl.Buffered(1))
            except TypeError:
                pass
        return pl.BlockSpec(shape, index_map)

    tok_spec = pl.BlockSpec((block_rows, E), lambda i, h: (i, 0))
    in_specs = [
        tok_spec,                                            # x
        tok_spec,                                            # attention output
        spec((E, tk_h), lambda i, h: (0, h), w_single),      # w1 tile
        spec((1, tk_h), lambda i, h: (0, h), w_single),      # b1 tile
        spec((tk_h, E), lambda i, h: (h, 0), w_single),      # w2 tile
        spec((1, E), lambda i, h: (0, 0), True),             # b2
        spec((1, E), lambda i, h: (0, 0), True),             # ln1 gamma
        spec((1, E), lambda i, h: (0, 0), True),             # ln1 beta
        spec((1, E), lambda i, h: (0, 0), True),             # ln2 gamma
        spec((1, E), lambda i, h: (0, 0), True),             # ln2 beta
    ]

    x2 = x.reshape(rows, E)
    a2 = output.reshape(rows, E)

    out2 = pl.pallas_call(
        _pwfc_kernel,
        out_shape=jax.ShapeDtypeStruct((rows, E), x.dtype),
        grid_spec=pltpu.PrefetchScalarGridSpec(
            num_scalar_prefetch=0,
            grid=(grid_rows, grid_h),
            in_specs=in_specs,
            out_specs=tok_spec,
            scratch_shapes=[
                pltpu.VMEM((block_rows, E), jnp.float32),    # LN1 (f32, LN2 residual)
                pltpu.VMEM((block_rows, E), jnp.bfloat16),   # LN1 (bf16, fc1 operand)
                pltpu.VMEM((block_rows, E), jnp.float32),    # FFN accumulator
            ],
        ),
        compiler_params=pltpu.CompilerParams(
            dimension_semantics=("parallel", "arbitrary"),
            vmem_limit_bytes=vmem_limit,
        ),
        cost_estimate=cost,
    )(x2, a2,
      params["w1"], params["b1"], params["w2"], params["b2"],
      params["g1"], params["be1"], params["g2"], params["be2"])

    return out2.reshape(B, S, E)


def init_params(key, emb_dim, hidden_dim, dtype=jnp.float32):
    """Deterministic parameter init (matches the PyTorch module's shapes)."""
    k1, k2, k3, k4 = jax.random.split(key, 4)
    lim1 = 1.0 / (emb_dim ** 0.5)
    lim2 = 1.0 / (hidden_dim ** 0.5)
    return {
        # fc1: Linear(emb, hidden); stored transposed so y = x @ w1 + b1.
        "w1": jax.random.uniform(k1, (emb_dim, hidden_dim), dtype, -lim1, lim1),
        "b1": jax.random.uniform(k2, (1, hidden_dim), dtype, -lim1, lim1),
        # fc2: Linear(hidden, emb); stored as [hidden, emb].
        "w2": jax.random.uniform(k3, (hidden_dim, emb_dim), dtype, -lim2, lim2),
        "b2": jax.random.uniform(k4, (1, emb_dim), dtype, -lim2, lim2),
        # LayerNorm affine params (PyTorch init: gamma=1, beta=0).
        "g1": jnp.ones((1, emb_dim), dtype),
        "be1": jnp.zeros((1, emb_dim), dtype),
        "g2": jnp.ones((1, emb_dim), dtype),
        "be2": jnp.zeros((1, emb_dim), dtype),
    }


def prepare_params(params):
    """One-time cast at setup (hoisted out of the per-call jitted wrapper):
    weights to bf16 (MXU-native, half the VMEM/HBM traffic), vectors to f32."""
    return {
        "w1": jnp.asarray(params["w1"], jnp.bfloat16),
        "b1": jnp.asarray(params["b1"], jnp.float32),
        "w2": jnp.asarray(params["w2"], jnp.bfloat16),
        "b2": jnp.asarray(params["b2"], jnp.float32),
        "g1": jnp.asarray(params["g1"], jnp.float32),
        "be1": jnp.asarray(params["be1"], jnp.float32),
        "g2": jnp.asarray(params["g2"], jnp.float32),
        "be2": jnp.asarray(params["be2"], jnp.float32),
    }


def _reference(x, output, p):
    """Pure-JAX f32 reference."""
    def ln(v, g, b):
        mu = jnp.mean(v, axis=-1, keepdims=True)
        var = jnp.mean((v - mu) ** 2, axis=-1, keepdims=True)
        return (v - mu) * jax.lax.rsqrt(var + LN_EPS) * g + b

    h = ln(x + output, p["g1"], p["be1"])
    ff = jnp.maximum(h @ p["w1"] + p["b1"], 0.0) @ p["w2"] + p["b2"]
    return ln(h + ff, p["g2"], p["be2"])


if __name__ == "__main__":
    B, S, E, H = 2, 8, 32, 64
    key = jax.random.PRNGKey(0)
    kx, ko, kp = jax.random.split(key, 3)

    x = jax.random.normal(kx, (B, S, E), jnp.float32)
    attn_out = jax.random.normal(ko, (B, S, E), jnp.float32)
    params = init_params(kp, E, H)
    kparams = prepare_params(params)      # one-time bf16 weight cast

    y = position_wise_fc(x, attn_out, kparams)
    y = jax.block_until_ready(y)

    y_ref = _reference(x, attn_out, params)
    assert y.shape == (B, S, E)
    # bf16 matmul operands (f32 accumulation) -> allow small drift vs f32 ref.
    assert jnp.allclose(y, y_ref, atol=5e-2, rtol=5e-2)

    print("KERNEL_OK")
</pallas_src>

<mosaic_0001>
module attributes {stable_mosaic.version = 11 : i64} {
  func.func @_pwfc_kernel(%arg0: i32, %arg1: i32, %arg2: memref<16x32xf32, #tpu.memory_space<vmem>>, %arg3: memref<16x32xf32, #tpu.memory_space<vmem>>, %arg4: memref<32x64xbf16, #tpu.memory_space<vmem>>, %arg5: memref<1x64xf32, #tpu.memory_space<vmem>>, %arg6: memref<64x32xbf16, #tpu.memory_space<vmem>>, %arg7: memref<1x32xf32, #tpu.memory_space<vmem>>, %arg8: memref<1x32xf32, #tpu.memory_space<vmem>>, %arg9: memref<1x32xf32, #tpu.memory_space<vmem>>, %arg10: memref<1x32xf32, #tpu.memory_space<vmem>>, %arg11: memref<1x32xf32, #tpu.memory_space<vmem>>, %arg12: memref<16x32xf32, #tpu.memory_space<vmem>>, %arg13: memref<16x32xf32, #tpu.memory_space<vmem>>, %arg14: memref<16x32xbf16, #tpu.memory_space<vmem>>, %arg15: memref<16x32xf32, #tpu.memory_space<vmem>>) attributes {dimension_semantics = [#tpu.dimension_semantics<parallel>, #tpu.dimension_semantics<arbitrary>], iteration_bounds = array<i64: 1, 1>, scalar_prefetch = 0 : i64, scratch_operands = 3 : i64, tpu.core_type = #tpu.core_type<tc>, window_params = [{transform_indices = @transform_0, window_bounds = array<i64: 16, 32>}, {transform_indices = @transform_1, window_bounds = array<i64: 16, 32>}, {pipeline_mode = #tpu.pipeline_mode<synchronous>, transform_indices = @transform_2, window_bounds = array<i64: 32, 64>}, {pipeline_mode = #tpu.pipeline_mode<synchronous>, transform_indices = @transform_3, window_bounds = array<i64: 1, 64>}, {pipeline_mode = #tpu.pipeline_mode<synchronous>, transform_indices = @transform_4, window_bounds = array<i64: 64, 32>}, {pipeline_mode = #tpu.pipeline_mode<synchronous>, transform_indices = @transform_5, window_bounds = array<i64: 1, 32>}, {pipeline_mode = #tpu.pipeline_mode<synchronous>, transform_indices = @transform_6, window_bounds = array<i64: 1, 32>}, {pipeline_mode = #tpu.pipeline_mode<synchronous>, transform_indices = @transform_7, window_bounds = array<i64: 1, 32>}, {pipeline_mode = #tpu.pipeline_mode<synchronous>, transform_indices = @transform_8, window_bounds = array<i64: 1, 32>}, {pipeline_mode = #tpu.pipeline_mode<synchronous>, transform_indices = @transform_9, window_bounds = array<i64: 1, 32>}, {transform_indices = @transform_10, window_bounds = array<i64: 16, 32>}]} {
    %c0_i32 = arith.constant 0 : i32
    %0 = arith.cmpi eq, %arg1, %c0_i32 : i32
    %1 = arith.extui %0 : i1 to i32
    %c0_i32_0 = arith.constant 0 : i32
    %2 = arith.cmpi ne, %1, %c0_i32_0 : i32
    scf.if %2 {
      %c0_16 = arith.constant 0 : index
      %c0_17 = arith.constant 0 : index
      %20 = vector.load %arg2[%c0_16, %c0_17] : memref<16x32xf32, #tpu.memory_space<vmem>>, vector<16x32xf32>
      %c0_18 = arith.constant 0 : index
      %c0_19 = arith.constant 0 : index
      %21 = vector.load %arg3[%c0_18, %c0_19] : memref<16x32xf32, #tpu.memory_space<vmem>>, vector<16x32xf32>
      %22 = arith.addf %20, %21 : vector<16x32xf32>
      %cst_20 = arith.constant dense<0.000000e+00> : vector<16xf32>
      %23 = vector.multi_reduction <add>, %22, %cst_20 [1] : vector<16x32xf32> to vector<16xf32>
      %24 = vector.shape_cast %23 : vector<16xf32> to vector<16x1xf32>
      %cst_21 = arith.constant 3.200000e+01 : f32
      %25 = vector.broadcast %cst_21 : f32 to vector<16x1xf32>
      %26 = arith.divf %24, %25 : vector<16x1xf32>
      %27 = arith.mulf %22, %22 : vector<16x32xf32>
      %cst_22 = arith.constant dense<0.000000e+00> : vector<16xf32>
      %28 = vector.multi_reduction <add>, %27, %cst_22 [1] : vector<16x32xf32> to vector<16xf32>
      %29 = vector.shape_cast %28 : vector<16xf32> to vector<16x1xf32>
      %cst_23 = arith.constant 3.200000e+01 : f32
      %30 = vector.broadcast %cst_23 : f32 to vector<16x1xf32>
      %31 = arith.divf %29, %30 : vector<16x1xf32>
      %32 = arith.mulf %26, %26 : vector<16x1xf32>
      %33 = arith.subf %31, %32 : vector<16x1xf32>
      %cst_24 = arith.constant 0.000000e+00 : f32
      %34 = vector.broadcast %cst_24 : f32 to vector<16x1xf32>
      %35 = arith.maximumf %33, %34 : vector<16x1xf32>
      %36 = vector.broadcast %26 : vector<16x1xf32> to vector<16x32xf32>
      %37 = arith.subf %22, %36 : vector<16x32xf32>
      %cst_25 = arith.constant 9.99999974E-6 : f32
      %38 = vector.broadcast %cst_25 : f32 to vector<16x1xf32>
      %39 = arith.addf %35, %38 : vector<16x1xf32>
      %40 = math.rsqrt %39 : vector<16x1xf32>
      %41 = vector.broadcast %40 : vector<16x1xf32> to vector<16x32xf32>
      %42 = arith.mulf %37, %41 : vector<16x32xf32>
      %c0_26 = arith.constant 0 : index
      %c0_27 = arith.constant 0 : index
      %43 = vector.load %arg8[%c0_26, %c0_27] : memref<1x32xf32, #tpu.memory_space<vmem>>, vector<1x32xf32>
      %44 = vector.broadcast %43 : vector<1x32xf32> to vector<16x32xf32>
      %45 = arith.mulf %42, %44 : vector<16x32xf32>
      %c0_28 = arith.constant 0 : index
      %c0_29 = arith.constant 0 : index
      %46 = vector.load %arg9[%c0_28, %c0_29] : memref<1x32xf32, #tpu.memory_space<vmem>>, vector<1x32xf32>
      %47 = vector.broadcast %46 : vector<1x32xf32> to vector<16x32xf32>
      %48 = arith.addf %45, %47 : vector<16x32xf32>
      %c0_30 = arith.constant 0 : index
      %c0_31 = arith.constant 0 : index
      %49 = vector.load %arg13[%c0_30, %c0_31] : memref<16x32xf32, #tpu.memory_space<vmem>>, vector<16x32xf32>
      tpu.vector_store %arg13[%c0_30, %c0_31], %48 {strides = array<i32>} : memref<16x32xf32, #tpu.memory_space<vmem>>, vector<16x32xf32>,
      %50 = arith.truncf %48 : vector<16x32xf32> to vector<16x32xbf16>
      %c0_32 = arith.constant 0 : index
      %c0_33 = arith.constant 0 : index
      %51 = vector.load %arg14[%c0_32, %c0_33] : memref<16x32xbf16, #tpu.memory_space<vmem>>, vector<16x32xbf16>
      tpu.vector_store %arg14[%c0_32, %c0_33], %50 {strides = array<i32>} : memref<16x32xbf16, #tpu.memory_space<vmem>>, vector<16x32xbf16>,
      %cst_34 = arith.constant 0.000000e+00 : f32
      %52 = vector.broadcast %cst_34 : f32 to vector<16x32xf32>
      %c0_35 = arith.constant 0 : index
      %c0_36 = arith.constant 0 : index
      %53 = vector.load %arg15[%c0_35, %c0_36] : memref<16x32xf32, #tpu.memory_space<vmem>>, vector<16x32xf32>
      tpu.vector_store %arg15[%c0_35, %c0_36], %52 {strides = array<i32>} : memref<16x32xf32, #tpu.memory_space<vmem>>, vector<16x32xf32>,
    } else {
    }
    %c0 = arith.constant 0 : index
    %c0_1 = arith.constant 0 : index
    %3 = vector.load %arg14[%c0, %c0_1] : memref<16x32xbf16, #tpu.memory_space<vmem>>, vector<16x32xbf16>
    %c0_2 = arith.constant 0 : index
    %c0_3 = arith.constant 0 : index
    %4 = vector.load %arg4[%c0_2, %c0_3] : memref<32x64xbf16, #tpu.memory_space<vmem>>, vector<32x64xbf16>
    %cst = arith.constant dense<0.000000e+00> : vector<16x64xf32>
    %5 = tpu.matmul %3, %4, %cst {dimension_numbers = #tpu.dot_dimension_numbers<[1], [0], [0], [1], [0, 0, 1, 1], [], []>} : vector<16x32xbf16>, vector<32x64xbf16>, vector<16x64xf32> -> vector<16x64xf32>
    %c0_4 = arith.constant 0 : index
    %c0_5 = arith.constant 0 : index
    %6 = vector.load %arg5[%c0_4, %c0_5] : memref<1x64xf32, #tpu.memory_space<vmem>>, vector<1x64xf32>
    %7 = vector.broadcast %6 : vector<1x64xf32> to vector<16x64xf32>
    %8 = arith.addf %5, %7 : vector<16x64xf32>
    %cst_6 = arith.constant 0.000000e+00 : f32
    %9 = vector.broadcast %cst_6 : f32 to vector<16x64xf32>
    %10 = arith.maximumf %8, %9 : vector<16x64xf32>
    %c0_7 = arith.constant 0 : index
    %c0_8 = arith.constant 0 : index
    %11 = vector.load %arg15[%c0_7, %c0_8] : memref<16x32xf32, #tpu.memory_space<vmem>>, vector<16x32xf32>
    %12 = arith.truncf %10 : vector<16x64xf32> to vector<16x64xbf16>
    %c0_9 = arith.constant 0 : index
    %c0_10 = arith.constant 0 : index
    %13 = vector.load %arg6[%c0_9, %c0_10] : memref<64x32xbf16, #tpu.memory_space<vmem>>, vector<64x32xbf16>
    %cst_11 = arith.constant dense<0.000000e+00> : vector<16x32xf32>
    %14 = tpu.matmul %12, %13, %cst_11 {dimension_numbers = #tpu.dot_dimension_numbers<[1], [0], [0], [1], [0, 0, 1, 1], [], []>} : vector<16x64xbf16>, vector<64x32xbf16>, vector<16x32xf32> -> vector<16x32xf32>
    %15 = arith.addf %11, %14 : vector<16x32xf32>
    %c0_12 = arith.constant 0 : index
    %c0_13 = arith.constant 0 : index
    %16 = vector.load %arg15[%c0_12, %c0_13] : memref<16x32xf32, #tpu.memory_space<vmem>>, vector<16x32xf32>
    tpu.vector_store %arg15[%c0_12, %c0_13], %15 {strides = array<i32>} : memref<16x32xf32, #tpu.memory_space<vmem>>, vector<16x32xf32>,
    %c0_i32_14 = arith.constant 0 : i32
    %17 = arith.cmpi eq, %arg1, %c0_i32_14 : i32
    %18 = arith.extui %17 : i1 to i32
    %c0_i32_15 = arith.constant 0 : i32
    %19 = arith.cmpi ne, %18, %c0_i32_15 : i32
    scf.if %19 {
      %c0_16 = arith.constant 0 : index
      %c0_17 = arith.constant 0 : index
      %20 = vector.load %arg13[%c0_16, %c0_17] : memref<16x32xf32, #tpu.memory_space<vmem>>, vector<16x32xf32>
      %c0_18 = arith.constant 0 : index
      %c0_19 = arith.constant 0 : index
      %21 = vector.load %arg15[%c0_18, %c0_19] : memref<16x32xf32, #tpu.memory_space<vmem>>, vector<16x32xf32>
      %22 = arith.addf %20, %21 : vector<16x32xf32>
      %c0_20 = arith.constant 0 : index
      %c0_21 = arith.constant 0 : index
      %23 = vector.load %arg7[%c0_20, %c0_21] : memref<1x32xf32, #tpu.memory_space<vmem>>, vector<1x32xf32>
      %24 = vector.broadcast %23 : vector<1x32xf32> to vector<16x32xf32>
      %25 = arith.addf %22, %24 : vector<16x32xf32>
      %cst_22 = arith.constant dense<0.000000e+00> : vector<16xf32>
      %26 = vector.multi_reduction <add>, %25, %cst_22 [1] : vector<16x32xf32> to vector<16xf32>
      %27 = vector.shape_cast %26 : vector<16xf32> to vector<16x1xf32>
      %cst_23 = arith.constant 3.200000e+01 : f32
      %28 = vector.broadcast %cst_23 : f32 to vector<16x1xf32>
      %29 = arith.divf %27, %28 : vector<16x1xf32>
      %30 = arith.mulf %25, %25 : vector<16x32xf32>
      %cst_24 = arith.constant dense<0.000000e+00> : vector<16xf32>
      %31 = vector.multi_reduction <add>, %30, %cst_24 [1] : vector<16x32xf32> to vector<16xf32>
      %32 = vector.shape_cast %31 : vector<16xf32> to vector<16x1xf32>
      %cst_25 = arith.constant 3.200000e+01 : f32
      %33 = vector.broadcast %cst_25 : f32 to vector<16x1xf32>
      %34 = arith.divf %32, %33 : vector<16x1xf32>
      %35 = arith.mulf %29, %29 : vector<16x1xf32>
      %36 = arith.subf %34, %35 : vector<16x1xf32>
      %cst_26 = arith.constant 0.000000e+00 : f32
      %37 = vector.broadcast %cst_26 : f32 to vector<16x1xf32>
      %38 = arith.maximumf %36, %37 : vector<16x1xf32>
      %39 = vector.broadcast %29 : vector<16x1xf32> to vector<16x32xf32>
      %40 = arith.subf %25, %39 : vector<16x32xf32>
      %cst_27 = arith.constant 9.99999974E-6 : f32
      %41 = vector.broadcast %cst_27 : f32 to vector<16x1xf32>
      %42 = arith.addf %38, %41 : vector<16x1xf32>
      %43 = math.rsqrt %42 : vector<16x1xf32>
      %44 = vector.broadcast %43 : vector<16x1xf32> to vector<16x32xf32>
      %45 = arith.mulf %40, %44 : vector<16x32xf32>
      %c0_28 = arith.constant 0 : index
      %c0_29 = arith.constant 0 : index
      %46 = vector.load %arg10[%c0_28, %c0_29] : memref<1x32xf32, #tpu.memory_space<vmem>>, vector<1x32xf32>
      %47 = vector.broadcast %46 : vector<1x32xf32> to vector<16x32xf32>
      %48 = arith.mulf %45, %47 : vector<16x32xf32>
      %c0_30 = arith.constant 0 : index
      %c0_31 = arith.constant 0 : index
      %49 = vector.load %arg11[%c0_30, %c0_31] : memref<1x32xf32, #tpu.memory_space<vmem>>, vector<1x32xf32>
      %50 = vector.broadcast %49 : vector<1x32xf32> to vector<16x32xf32>
      %51 = arith.addf %48, %50 : vector<16x32xf32>
      %c0_32 = arith.constant 0 : index
      %c0_33 = arith.constant 0 : index
      %52 = vector.load %arg12[%c0_32, %c0_33] : memref<16x32xf32, #tpu.memory_space<vmem>>, vector<16x32xf32>
      tpu.vector_store %arg12[%c0_32, %c0_33], %51 {strides = array<i32>} : memref<16x32xf32, #tpu.memory_space<vmem>>, vector<16x32xf32>,
    } else {
    }
    return
  }
  func.func @transform_0(%arg0: i32, %arg1: i32) -> (i32, i32) {
    %c0_i32 = arith.constant 0 : i32
    %c0_i32_0 = arith.constant 0 : i32
    return %arg0, %c0_i32 : i32, i32
  }
  func.func @transform_1(%arg0: i32, %arg1: i32) -> (i32, i32) {
    %c0_i32 = arith.constant 0 : i32
    %c0_i32_0 = arith.constant 0 : i32
    return %arg0, %c0_i32 : i32, i32
  }
  func.func @transform_2(%arg0: i32, %arg1: i32) -> (i32, i32) {
    %c0_i32 = arith.constant 0 : i32
    %c0_i32_0 = arith.constant 0 : i32
    return %c0_i32, %arg1 : i32, i32
  }
  func.func @transform_3(%arg0: i32, %arg1: i32) -> (i32, i32) {
    %c0_i32 = arith.constant 0 : i32
    %c0_i32_0 = arith.constant 0 : i32
    return %c0_i32, %arg1 : i32, i32
  }
  func.func @transform_4(%arg0: i32, %arg1: i32) -> (i32, i32) {
    %c0_i32 = arith.constant 0 : i32
    %c0_i32_0 = arith.constant 0 : i32
    return %arg1, %c0_i32 : i32, i32
  }
  func.func @transform_5(%arg0: i32, %arg1: i32) -> (i32, i32) {
    %c0_i32 = arith.constant 0 : i32
    %c0_i32_0 = arith.constant 0 : i32
    %c0_i32_1 = arith.constant 0 : i32
    return %c0_i32, %c0_i32_0 : i32, i32
  }
  func.func @transform_6(%arg0: i32, %arg1: i32) -> (i32, i32) {
    %c0_i32 = arith.constant 0 : i32
    %c0_i32_0 = arith.constant 0 : i32
    %c0_i32_1 = arith.constant 0 : i32
    return %c0_i32, %c0_i32_0 : i32, i32
  }
  func.func @transform_7(%arg0: i32, %arg1: i32) -> (i32, i32) {
    %c0_i32 = arith.constant 0 : i32
    %c0_i32_0 = arith.constant 0 : i32
    %c0_i32_1 = arith.constant 0 : i32
    return %c0_i32, %c0_i32_0 : i32, i32
  }
  func.func @transform_8(%arg0: i32, %arg1: i32) -> (i32, i32) {
    %c0_i32 = arith.constant 0 : i32
    %c0_i32_0 = arith.constant 0 : i32
    %c0_i32_1 = arith.constant 0 : i32
    return %c0_i32, %c0_i32_0 : i32, i32
  }
  func.func @transform_9(%arg0: i32, %arg1: i32) -> (i32, i32) {
    %c0_i32 = arith.constant 0 : i32
    %c0_i32_0 = arith.constant 0 : i32
    %c0_i32_1 = arith.constant 0 : i32
    return %c0_i32, %c0_i32_0 : i32, i32
  }
  func.func @transform_10(%arg0: i32, %arg1: i32) -> (i32, i32) {
    %c0_i32 = arith.constant 0 : i32
    %c0_i32_0 = arith.constant 0 : i32
    return %arg0, %c0_i32 : i32, i32
  }
}

</mosaic_0001>

<bundles_post_ra>
// kernel: position_wise_fc.1
= control target key start
LH: loop header
LB: loop body
LE: loop exit
PB: predicated region body
PF: predicated region fallthrough
CT: control target
= control target key end

     0   :  { %vm47_vm0 = vcmask 261120   ;;  %s570_s0 = inlined_call_operand.vmem [shape: f32[16,32], index: 0, kind: input, shape index: {}]   ;;  %s571_s1 = inlined_call_operand.vmem [shape: f32[16,32], index: 1, kind: input, shape index: {}]   ;;  %s572_s2 = inlined_call_operand.vmem [shape: bf16[32,64], index: 2, kind: input, shape index: {}]   ;;  %s573_s3 = inlined_call_operand.vmem [shape: f32[1,64], index: 3, kind: input, shape index: {}]   ;;  %s574_s4 = inlined_call_operand.vmem [shape: bf16[64,32], index: 4, kind: input, shape index: {}]   ;;  %s575_s5 = inlined_call_operand.vmem [shape: f32[1,32], index: 5, kind: input, shape index: {}]   ;;  %s576_s6 = inlined_call_operand.vmem [shape: f32[1,32], index: 6, kind: input, shape index: {}]   ;;  %s577_s7 = inlined_call_operand.vmem [shape: f32[1,32], index: 7, kind: input, shape index: {}]   ;;  %s578_s8 = inlined_call_operand.vmem [shape: f32[1,32], index: 8, kind: input, shape index: {}]   ;;  %s579_s9 = inlined_call_operand.vmem [shape: f32[1,32], index: 9, kind: input, shape index: {}]   ;;  %s580_s10 = inlined_call_operand.hbm [shape: f32[16,32], index: 10, kind: output, shape index: {}]  }
   0x1   :  { %v41_v0 = vld [vmem:[%s570_s0] sm:$0xff]  ;;  %v42_v2 = vld [vmem:[%s570_s0 + $0x8] sm:$0xff] }
   0x2   :  { %v43_v1 = vld [vmem:[%s571_s1] sm:$0xff]  ;;  %v44_v4 = vld [vmem:[%s571_s1 + $0x8] sm:$0xff] }
   0x3   :  { %v45_v3 = vadd.f32 %v43_v1, %v41_v0  ;;  %v46_v5 = vadd.f32 %v44_v4, %v42_v2 }
   0x5   :  { %v48_v6 = vsel %vm47_vm0, %v45_v3, 0.0  ;;  %v57_v7 = vmul.f32 %v45_v3, %v45_v3  ;;  %v58_v8 = vmul.f32 %v46_v5, %v46_v5  ;;  %v51_v10 = vsel %vm47_vm0, %v46_v5, 0.0 }
   0x6   :  { %49 = vadd.xlane.f32.xlu0 %v48_v6 }
   0x7   :  { %v59_v9 = vsel %vm47_vm0, %v57_v7, 0.0 }
   0x8   :  { %60 = vadd.xlane.f32.xlu1 %v59_v9 }
   0x9   :  { %15 = vsyncpa [#allocation6], 0  ;;  %v62_v11 = vsel %vm47_vm0, %v58_v8, 0.0  ;;  %v394_v12 = vld [vmem:[%s572_s2] sm:$0xff]   ;;  %v432_v13 = vmov 0.0   ;;  %v395_v14 = vld [vmem:[%s572_s2 + $0x8] sm:$0xff]  }
   0xa   :  { %52 = vadd.xlane.f32.xlu0 %v51_v10  ;;  %369 = vmatprep.subr.bf16.mxu0 %v432_v13  ;;  %103 = vst.msk [vmem:[#allocation4] sm:$0xff] %vm47_vm0, %v432_v13  ;;  %104 = vst.msk [vmem:[#allocation4 + $0x8] sm:$0xff] %vm47_vm0, %v432_v13  ;;  %vm433_vm1 = vmmov 0   ;;  %v396_v15 = vld [vmem:[%s574_s4] sm:$0xff]   ;;  %v397_v16 = vld [vmem:[%s574_s4 + $0x8] sm:$0xff]   ;;  %vm211_vm2 = vcmask 523264  }
   0xb   :  { %377 = vmatprep.subr.bf16.mxu1 %v432_v13  ;;  %370 = vmatpush3.bf16.msra.mxu0 %v394_v12  ;;  %v347_v35 = vld [vmem:[%s576_s6] ss:$0 sm:$0xff]  ;;  %v398_v47 = vld [vmem:[%s574_s4 + $0x10] sm:$0xff]   ;;  %v399_v48 = vld [vmem:[%s574_s4 + $0x18] sm:$0xff]   ;;  %s434_s17 = smov [#allocation5]  }
   0xc   :  { %63 = vadd.xlane.f32.xlu1 %v62_v11  ;;  %373 = vmatprep.mubr.msk.bf16.mxu0 %vm433_vm1, %v432_v13  ;;  %v348_v37 = vld [vmem:[%s577_s7] ss:$0 sm:$0xff]  ;;  %s336_s18 = sshll.u32 %s434_s17, 4  ;;  %s337_s18 = int_to_ptr.vmem [resolvable:$true] %s336_s18 }
   0xd   :  { %371 = vmatprep.subr.bf16.mxu0 %v432_v13  ;;  %385 = vmatprep.mubr.msk.bf16.mxu1 %vm433_vm1, %v432_v13  ;;  %v349_v49 = vld [vmem:[%s573_s3] ss:$0 sm:$0xff]  ;;  %p413_p1 = scmp.lt.s32.totalorder %s337_s18, %s337_s18 }
   0xe   :  { %378 = vmatpush3.bf16.msra.mxu1 %v396_v15 }
   0xf   :  { %372 = vmatpush3.bf16.msra.mxu0 %v395_v14  ;;  %379 = vmatprep.subr.bf16.mxu1 %v432_v13 }
  0x11   :  { %v176_v59 = vld [vmem:[#allocation4] sm:$0xff]  ;;  %v177_v61 = vld [vmem:[#allocation4 + $0x8] sm:$0xff] }
  0x12   :  { %380 = vmatpush3.bf16.msra.mxu1 %v397_v16 }
  0x13   :  { %381 = vmatprep.subr.bf16.mxu1 %v432_v13 }
  0x16   :  { %382 = vmatpush3.bf16.msra.mxu1 %v398_v47 }
  0x17   :  { %383 = vmatprep.subr.bf16.mxu1 %v432_v13 }
  0x1a   :  { %384 = vmatpush3.bf16.msra.mxu1 %v399_v48 }
  0x93   :  { %v50_v17 = vpop.xlane.xlu0 %49 }
  0x94   :  { %v55_v18 = vmul.f32 0.03125, %v50_v17 }
  0x95   :  { %v61_v19 = vpop.xlane.xlu1 %60 }
  0x96   :  { %v67_v20 = vmul.f32 %v55_v18, %v55_v18  ;;  %v65_v21 = vmul.f32 0.03125, %v61_v19  ;;  %v73_v33 = vsub.f32 %v45_v3, %v55_v18 }
  0x97   :  { %v53_v22 = vpop.xlane.xlu0 %52 }
  0x98   :  { %v69_v23 = vsub.f32 %v65_v21, %v67_v20  ;;  %v56_v24 = vmul.f32 0.03125, %v53_v22 }
  0x99   :  { %v64_v25 = vpop.xlane.xlu1 %63 }
  0x9a   :  { %v71_v26 = vmax.f32 %v69_v23, 0.0  ;;  %v68_v27 = vmul.f32 %v56_v24, %v56_v24  ;;  %v66_v28 = vmul.f32 0.03125, %v64_v25  ;;  %v74_v39 = vsub.f32 %v46_v5, %v56_v24  ;;  %v358_v5 = vld [vmem:[%s575_s5] ss:$0 sm:$0xff] }
  0x9c   :  { %v75_v29 = vadd.f32 1e-05, %v71_v26  ;;  %v70_v30 = vsub.f32 %v66_v28, %v68_v27 }
  0x9e   :  { %400 = vrsqrt.f32 %v75_v29  ;;  %v72_v31 = vmax.f32 %v70_v30, 0.0 }
  0xa0   :  { %v76_v32 = vadd.f32 1e-05, %v72_v31 }
  0xa2   :  { %402 = vrsqrt.f32 %v76_v32 }
  0xa8   :  { %v401_v34 = vpop.eup %400 }
  0xa9   :  { %v79_v36 = vmul.f32 %v401_v34, %v73_v33 }
  0xab   :  { %v88_v38 = vmul.f32 %v347_v35, %v79_v36  ;;  %v359_v36 = vld [vmem:[%s578_s8] ss:$0 sm:$0xff]  ;;  %s408_s8 = scalar_lea.vmem %s337_s18, 256 }
  0xac   :  { %v403_v40 = vpop.eup %402  ;;  %p409_p0 = scmp.ne.s32.totalorder %s337_s18, %s408_s8  ;;  %p414_p2 = scmp.lt.s32.totalorder %s408_s8, %s408_s8 }
  0xad   :  { %v97_v41 = vadd.f32 %v348_v37, %v88_v38  ;;  %v80_v42 = vmul.f32 %v403_v40, %v74_v39  ;;  %v360_v40 = vld [vmem:[%s579_s9] ss:$0 sm:$0xff] }
  0xae   :  { %p415_p3 = por %p414_p2, %p413_p1 }
  0xaf   :  { %99 = vst.msk [vmem:[#allocation2] sm:$0xff] %vm47_vm0, %v97_v41  ;;  %v89_v43 = vmul.f32 %v347_v35, %v80_v42 }
  0xb0   :  { %p416_p4 = pnand %p415_p3, %p409_p0 }
  0xb1   :  { %v98_v44 = vadd.f32 %v348_v37, %v89_v43 }
  0xb3   :  { %100 = vst.msk [vmem:[#allocation2 + $0x8] sm:$0xff] %vm47_vm0, %v98_v44  ;;  %v101_v45 = vpack.c.bf16 %v98_v44, %v97_v41 }
  0xb5   :  { %102 = vst.msk [vmem:[#allocation3] sm:$0xff] %vm47_vm0, %v101_v45 }
  0xb6   :  { %v263_v3 = vld [vmem:[#allocation2] sm:$0xff] }
  0xba   :  { %v264_v7 = vld [vmem:[#allocation2 + $0x8] sm:$0xff] }
  0xbc   :  { %v105_v46 = vld [vmem:[#allocation3] sm:$0xff] }
  0xbd   :  { %374 = vmatmul.mubr.msk.bf16.vlgmr.msra.gmra.mrb[0].mxu0 %vm47_vm0, %v105_v46 }
 0x190   :  { %v167_v50 = vpop.f32.mrb[0].mxu0 }
 0x191   :  { %v168_v51 = vadd.f32 %v349_v49, %v167_v50  ;;  %v375_v52 = vpop.f32.mrb[1].mxu0 }
 0x192   :  { %v170_v53 = vpop.f32.mrb[2].mxu0 }
 0x193   :  { %v171_v54 = vadd.f32 %v349_v49, %v170_v53  ;;  %v376_v55 = vpop.f32.mrb[3].mxu0  ;;  %v174_v56 = vmax.f32 %v168_v51, 0.0 }
 0x195   :  { %v175_v57 = vmax.f32 %v171_v54, 0.0 }
 0x197   :  { %v178_v58 = vpack.c.bf16 %v175_v57, %v174_v56 }
 0x199   :  { %386 = vmatmul.mubr.msk.bf16.vlgmr.msra.gmra.mrb[0].mxu1 %vm211_vm2, %v178_v58 }
 0x26c   :  { %v249_v60 = vpop.f32.mrb[0].mxu1 }
 0x26d   :  { %v256_v62 = vadd.f32 %v249_v60, %v176_v59  ;;  %v387_v63 = vpop.f32.mrb[1].mxu1 }
 0x26e   :  { %v252_v0 = vpop.f32.mrb[2].mxu1 }
 0x26f   :  { %258 = vst.msk [vmem:[#allocation4] sm:$0xff] %vm47_vm0, %v256_v62  ;;  %v257_v1 = vadd.f32 %v252_v0, %v177_v61  ;;  %v388_v2 = vpop.f32.mrb[3].mxu1 }
 0x271   :  { %259 = vst.msk [vmem:[#allocation4 + $0x8] sm:$0xff] %vm47_vm0, %v257_v1 }
 0x276   :  { %v265_v4 = vld [vmem:[#allocation4] sm:$0xff] }
 0x277   :  { %v267_v6 = vadd.f32 %v265_v4, %v263_v3 }
 0x278   :  { %v266_v8 = vld [vmem:[#allocation4 + $0x8] sm:$0xff] }
 0x279   :  { %v276_v9 = vadd.f32 %v358_v5, %v267_v6  ;;  %v268_v10 = vadd.f32 %v266_v8, %v264_v7 }
 0x27b   :  { %v278_v11 = vsel %vm47_vm0, %v276_v9, 0.0  ;;  %v277_v12 = vadd.f32 %v358_v5, %v268_v10  ;;  %v287_v13 = vmul.f32 %v276_v9, %v276_v9 }
 0x27c   :  { %279 = vadd.xlane.f32.xlu0 %v278_v11 }
 0x27d   :  { %v281_v14 = vsel %vm47_vm0, %v277_v12, 0.0  ;;  %v288_v15 = vmul.f32 %v277_v12, %v277_v12  ;;  %v289_v16 = vsel %vm47_vm0, %v287_v13, 0.0 }
 0x27e   :  { %282 = vadd.xlane.f32.xlu1 %v281_v14 }
 0x27f   :  { %v292_v17 = vsel %vm47_vm0, %v288_v15, 0.0 }
 0x280   :  { %290 = vadd.xlane.f32.xlu0 %v289_v16 }
 0x282   :  { %293 = vadd.xlane.f32.xlu1 %v292_v17 }
 0x309   :  { %v280_v18 = vpop.xlane.xlu0 %279 }
 0x30a   :  { %v285_v19 = vmul.f32 0.03125, %v280_v18 }
 0x30b   :  { %v283_v20 = vpop.xlane.xlu1 %282 }
 0x30c   :  { %v286_v21 = vmul.f32 0.03125, %v283_v20  ;;  %v297_v23 = vmul.f32 %v285_v19, %v285_v19  ;;  %v303_v34 = vsub.f32 %v276_v9, %v285_v19 }
 0x30d   :  { %v291_v22 = vpop.xlane.xlu0 %290 }
 0x30e   :  { %v295_v24 = vmul.f32 0.03125, %v291_v22  ;;  %v298_v26 = vmul.f32 %v286_v21, %v286_v21  ;;  %v304_v37 = vsub.f32 %v277_v12, %v286_v21 }
 0x30f   :  { %v294_v25 = vpop.xlane.xlu1 %293 }
 0x310   :  { %v299_v27 = vsub.f32 %v295_v24, %v297_v23  ;;  %v296_v28 = vmul.f32 0.03125, %v294_v25 }
 0x312   :  { %v301_v29 = vmax.f32 %v299_v27, 0.0  ;;  %v300_v30 = vsub.f32 %v296_v28, %v298_v26 }
 0x314   :  { %v305_v31 = vadd.f32 1e-05, %v301_v29  ;;  %v302_v32 = vmax.f32 %v300_v30, 0.0 }
 0x316   :  { %404 = vrsqrt.f32 %v305_v31  ;;  %v306_v33 = vadd.f32 1e-05, %v302_v32 }
 0x318   :  { %406 = vrsqrt.f32 %v306_v33 }
 0x320   :  { %v405_v35 = vpop.eup %404 }
 0x321   :  { %v309_v38 = vmul.f32 %v405_v35, %v303_v34 }
 0x322   :  { %v407_v39 = vpop.eup %406 }
 0x323   :  { %v310_v41 = vmul.f32 %v407_v39, %v304_v37  ;;  %v318_v42 = vmul.f32 %v359_v36, %v309_v38 }
 0x325   :  { %v319_v43 = vmul.f32 %v359_v36, %v310_v41  ;;  %v327_v44 = vadd.f32 %v360_v40, %v318_v42 }
 0x327   :  { %v328_v45 = vadd.f32 %v360_v40, %v319_v43  ;;  %329 = vst.msk [vmem:[#allocation5] sm:$0xff] %vm47_vm0, %v327_v44 }
 0x329   :  { %330 = vst.msk [vmem:[#allocation5 + $0x8] sm:$0xff] %vm47_vm0, %v328_v45 }
 0x32a   :  { %419 = shalt.err (!%p416_p4)
}
 0x32b   :  { %s420_s20 = scalar_lea.hbm %s580_s10, 256 }
 0x32c   :  { %p421_p5 = scmp.ne.s32.totalorder %s580_s10, %s420_s20  ;;  %p424_p6 = scmp.lt.u32.totalorder %s420_s20, %s580_s10 }
 0x32e   :  { %p426_p7 = pnand %p424_p6, %p421_p5 }
 0x330   :  { %429 = shalt.err (!%p426_p7)
}
 0x331   :  { %s435_s23 = smov 128   ;;  %s436_s24 = smov 8  }
 0x332   :  { %342 = dma.vmem_to_hbm [thread:$0]  %s337_s18, 256, %s580_s10, [#allocation6], %s435_s23, %s435_s23, %s436_s24  }
 0x333   :  { %430 = dma.done.wait [#allocation6], 256  }
 0x334   :  { %431 = vsyncadd [#allocation6], 4294967040 }
 0x335   :  { %346 = vsyncpa [#allocation6], 1 }

</bundles_post_ra>
